<compile_context>
chip_gen: v6e
topology: v6e:2x2x1
jax: 0.10.0
libtpu: 0.0.40
codegen_flags: <defaults>
</compile_context>

<pallas_src>
import jax
import jax.numpy as jnp
from jax.experimental import pallas as pl
from jax.experimental.pallas import tpu as pltpu

# ----------------------------- problem sizes -----------------------------
B = 8            # batch
C_IN = 4         # input channels
H = W = 16       # spatial
D_IN = C_IN * H * W          # 1024 flattened features fed to the teacher
NUM_CLASSES = 128            # classifier dim (lane aligned)
EMBED = 128                  # distill-token dim (lane aligned)

_VMEM = pl.BlockSpec(memory_space=pltpu.MemorySpace.VMEM)
_ANY = pl.BlockSpec(memory_space=pl.ANY)          # raw HBM ref, DMA'd manually
_SMEM_OUT = pl.BlockSpec(memory_space=pltpu.MemorySpace.SMEM)


# ----------------------------- Pallas kernels -----------------------------
def _ce_only_kernel(labels_ref, logits_ref, res_ref):
    # mean_b [ logsumexp(logits_b) - logits_b[label_b] ]   (== nn.CrossEntropyLoss)
    logits = logits_ref[...]
    bsz, ncls = logits.shape
    col = jax.lax.broadcasted_iota(jnp.int32, (bsz, ncls), 1)
    m = jnp.max(logits, axis=1, keepdims=True)
    lse = m + jnp.log(jnp.sum(jnp.exp(logits - m), axis=1, keepdims=True))
    picked = jnp.sum(jnp.where(col == labels_ref[...], logits, 0.0),
                     axis=1, keepdims=True)
    res_ref[0] = jnp.sum(lse - picked) * (1.0 / bsz)


def _make_fused_kernel(distillation_type, distill_token, alpha, tau, num_classes):
    """Build the fused loss kernel with all static config baked in."""
    inv_tau = 1.0 / float(tau)
    tau_sq = float(tau) * float(tau)
    alpha_f = float(alpha)

    def kernel(*refs):
        if distill_token:
            (labels_ref, out_ref, kd_ref, x_ref, w_hbm_ref, b_ref, tok_ref,
             res_ref, w_vmem, w_sem) = refs
        else:
            (labels_ref, out_ref, kd_ref, x_ref, w_hbm_ref, b_ref,
             res_ref, w_vmem, w_sem) = refs
            tok_ref = None

        # ---- (1) kick off the teacher-weight HBM -> VMEM DMA immediately; ----
        # ---- it overlaps with the student-side CE / log-softmax below.     ----
        w_cp = pltpu.make_async_copy(w_hbm_ref, w_vmem, w_sem)
        w_cp.start()

        # ---- (2) base cross-entropy (labels are int32 (B,1); mask in-kernel) ----
        logits = out_ref[...]
        bsz, ncls = logits.shape
        col = jax.lax.broadcasted_iota(jnp.int32, (bsz, ncls), 1)
        m = jnp.max(logits, axis=1, keepdims=True)
        lse = m + jnp.log(jnp.sum(jnp.exp(logits - m), axis=1, keepdims=True))
        picked = jnp.sum(jnp.where(col == labels_ref[...], logits, 0.0),
                         axis=1, keepdims=True)
        base_loss = jnp.sum(lse - picked) * (1.0 / bsz)

        # ---- (3) student-side distillation terms (no teacher needed yet) ----
        s = kd_ref[...]
        if distillation_type == "soft":
            ss = s * inv_tau
            smax = jnp.max(ss, axis=1, keepdims=True)
            es = jnp.exp(ss - smax)
            ssum = jnp.sum(es, axis=1, keepdims=True)
            ls = (ss - smax) - jnp.log(ssum)        # log_softmax(student / T)
        else:
            smax = jnp.max(s, axis=1, keepdims=True)
            s_lse = smax + jnp.log(jnp.sum(jnp.exp(s - smax), axis=1, keepdims=True))

        # ---- (4) teacher forward: wait for the weights only now, then one ----
        # ---- bf16 x bf16 MXU matmul with f32 accumulation (never hits HBM) ----
        w_cp.wait()
        teach = jnp.dot(x_ref[...].astype(jnp.bfloat16), w_vmem[...],
                        preferred_element_type=jnp.float32) + b_ref[...]

        # ---- (5) token MSE first, so the full `teach` tensor dies before ----
        # ---- the double-softmax KL temporaries come alive.               ----
        if distill_token:
            t_tok = teach[:, num_classes:]
            d = tok_ref[...] - t_tok
            token_loss = jnp.sum(d * d) * (1.0 / (d.shape[0] * d.shape[1]))
            t_logits = teach[:, :num_classes]
        else:
            token_loss = jnp.float32(0.0)
            t_logits = teach            # weight was pre-sliced: no unused columns

        # ---- (6) distillation loss ----
        if distillation_type == "soft":
            # KLDiv(log_softmax(s/T), log_softmax(t/T), 'sum', log_target=True)
            #   * T*T / s.numel()
            tt = t_logits * inv_tau
            tmax = jnp.max(tt, axis=1, keepdims=True)
            et = jnp.exp(tt - tmax)
            tsum = jnp.sum(et, axis=1, keepdims=True)
            lt = (tt - tmax) - jnp.log(tsum)        # log_softmax(teacher / T)
            p_t = et / tsum                          # exact softmax (torch parity)
            kl = jnp.sum(p_t * (lt - ls))
            distill_loss = kl * (tau_sq / (bsz * ncls))
        else:
            # CrossEntropy(student, argmax(teacher)); ties -> first index (torch)
            tmax = jnp.max(t_logits, axis=1, keepdims=True)
            arg = jnp.min(jnp.where(t_logits == tmax, col, ncls),
                          axis=1, keepdims=True)
            s_pick = jnp.sum(jnp.where(col == arg, s, 0.0), axis=1, keepdims=True)
            distill_loss = jnp.sum(s_lse - s_pick) * (1.0 / bsz)

        cls_loss = base_loss * (1.0 - alpha_f) + distill_loss * alpha_f

        # packed scalar results: [base, distill, token, cls]
        res_ref[0] = base_loss
        res_ref[1] = distill_loss
        res_ref[2] = token_loss
        res_ref[3] = cls_loss

    return kernel


# ----------------------------- DistillationLoss -----------------------------
class DistillationLossPallas:
    """JAX/Pallas port of DistillationLoss (forward pass).

    base_criterion := CrossEntropyLoss (mean); teacher_model := single linear head
    producing [class logits | distill token] from the flattened NCHW input.
    The pallas_call callables are constructed once here and the call paths are
    jitted, so repeated invocations hit the trace/compile cache.
    """

    def __init__(self, teacher_w, teacher_b, distillation_type, alpha, tau,
                 distill_token, num_classes=NUM_CLASSES):
        assert distillation_type in ["none", "soft", "hard"]
        self.distillation_type = distillation_type
        self.distill_token = bool(distill_token)
        self.alpha = float(alpha)
        self.tau = float(tau)
        self.num_classes = int(num_classes)

        if not self.distill_token:
            # Drop the unused token columns up front: halves the dominant HBM DMA
            # and halves MXU weight streaming for the no-token configs.
            teacher_w = teacher_w[:, :self.num_classes]
            teacher_b = teacher_b[:, :self.num_classes]
        # bf16 weights: halves HBM traffic; MXU accumulates in f32.
        # NOTE: teacher is frozen, so the bf16 cast is acceptable (not bit-identical
        # to an f32 PyTorch teacher).
        self.teacher_w = jnp.asarray(teacher_w, dtype=jnp.bfloat16)
        self.teacher_b = jnp.asarray(teacher_b, dtype=jnp.float32)

        # Build kernels + pallas_call callables ONCE; jit the call paths.
        self._ce_fn = jax.jit(self._build_ce_fn())
        self._loss_fn = None
        if self.distillation_type != "none":
            self._loss_fn = jax.jit(self._build_fused_fn())

    # -- 'none' path: base CE only --------------------------------------------
    def _build_ce_fn(self):
        pc = pl.pallas_call(
            _ce_only_kernel,
            out_shape=jax.ShapeDtypeStruct((1,), jnp.float32),
            in_specs=[_VMEM, _VMEM],
            out_specs=_SMEM_OUT,
            compiler_params=pltpu.CompilerParams(
                vmem_limit_bytes=4 * 1024 * 1024),
        )

        def fn(outputs, labels):
            labels2d = labels.astype(jnp.int32).reshape(-1, 1)
            return pc(labels2d, outputs)[0]

        return fn

    # -- fused soft/hard path ---------------------------------------------------
    def _build_fused_fn(self):
        d_in, w_cols = self.teacher_w.shape
        kernel = _make_fused_kernel(self.distillation_type, self.distill_token,
                                    self.alpha, self.tau, self.num_classes)

        in_specs = [_VMEM, _VMEM, _VMEM, _VMEM, _ANY, _VMEM]
        if self.distill_token:
            in_specs.append(_VMEM)

        pc = pl.pallas_call(
            kernel,
            out_shape=jax.ShapeDtypeStruct((4,), jnp.float32),
            in_specs=in_specs,
            out_specs=_SMEM_OUT,
            scratch_shapes=[
                pltpu.VMEM((d_in, w_cols), jnp.bfloat16),   # teacher weight buffer
                pltpu.SemaphoreType.DMA(()),                # its DMA semaphore
            ],
            compiler_params=pltpu.CompilerParams(
                vmem_limit_bytes=8 * 1024 * 1024),
        )

        w = self.teacher_w
        b = self.teacher_b

        if self.distill_token:
            def fn(inputs, outputs, outputs_kd, labels, token_outputs):
                labels2d = labels.astype(jnp.int32).reshape(-1, 1)
                # reshape only; bf16 cast happens inside the kernel
                x_flat = inputs.reshape(inputs.shape[0], -1)
                res = pc(labels2d, outputs, outputs_kd, x_flat, w, b,
                         token_outputs)
                return res[3], res[2]          # (cls_loss, token_loss)
        else:
            def fn(inputs, outputs, outputs_kd, labels):
                labels2d = labels.astype(jnp.int32).reshape(-1, 1)
                x_flat = inputs.reshape(inputs.shape[0], -1)
                res = pc(labels2d, outputs, outputs_kd, x_flat, w, b)
                return res[3]                   # cls_loss

        return fn

    # -- public forward ----------------------------------------------------------
    def __call__(self, inputs, outputs, labels, token_outputs=None):
        outputs_kd = None
        if isinstance(outputs, (tuple, list)):
            outputs, outputs_kd = outputs

        if self.distillation_type == "none":
            return self._ce_fn(outputs, labels)

        if self.distill_token:
            if token_outputs is None:
                raise ValueError(
                    "When distill token is enabled, the model is expected to gain "
                    "a token input"
                )
            return self._loss_fn(inputs, outputs, outputs_kd, labels,
                                 token_outputs)
        return self._loss_fn(inputs, outputs, outputs_kd, labels)


# ----------------------------- main -----------------------------
if __name__ == "__main__":
    key = jax.random.PRNGKey(0)
    k_in, k_out, k_kd, k_tok, k_lab, k_w, k_b = jax.random.split(key, 7)

    inputs = jax.random.normal(k_in, (B, C_IN, H, W), dtype=jnp.float32)
    outputs = jax.random.normal(k_out, (B, NUM_CLASSES), dtype=jnp.float32)
    outputs_kd = jax.random.normal(k_kd, (B, NUM_CLASSES), dtype=jnp.float32)
    token_outputs = jax.random.normal(k_tok, (B, EMBED), dtype=jnp.float32)
    labels = jax.random.randint(k_lab, (B,), 0, NUM_CLASSES, dtype=jnp.int32)

    # deterministic synthetic teacher parameters (linear: flattened image -> [cls|token])
    teacher_w = (jax.random.normal(k_w, (D_IN, NUM_CLASSES + EMBED), dtype=jnp.float32)
                 * (1.0 / jnp.sqrt(D_IN)))
    teacher_b = jax.random.normal(k_b, (1, NUM_CLASSES + EMBED), dtype=jnp.float32) * 0.01

    # soft distillation + distill token
    soft_mod = DistillationLossPallas(
        teacher_w, teacher_b,
        distillation_type="soft", alpha=0.5, tau=3.0, distill_token=True,
        num_classes=NUM_CLASSES,
    )
    cls_loss, token_loss = soft_mod(inputs, (outputs, outputs_kd), labels,
                                    token_outputs=token_outputs)
    jax.block_until_ready((cls_loss, token_loss))
    # second call exercises the cached jitted path (no retrace / recompile)
    cls_loss2, token_loss2 = soft_mod(inputs, (outputs, outputs_kd), labels,
                                      token_outputs=token_outputs)
    jax.block_until_ready((cls_loss2, token_loss2))

    # hard distillation, no token (weights pre-sliced to the class columns)
    hard_mod = DistillationLossPallas(
        teacher_w, teacher_b,
        distillation_type="hard", alpha=0.5, tau=1.0, distill_token=False,
        num_classes=NUM_CLASSES,
    )
    hard_loss = hard_mod(inputs, (outputs, outputs_kd), labels)
    jax.block_until_ready(hard_loss)

    # 'none' path (base CE only)
    none_mod = DistillationLossPallas(
        teacher_w, teacher_b,
        distillation_type="none", alpha=0.5, tau=1.0, distill_token=False,
        num_classes=NUM_CLASSES,
    )
    none_loss = none_mod(inputs, (outputs, outputs_kd), labels)
    jax.block_until_ready(none_loss)

    print("KERNEL_OK")
</pallas_src>

<mosaic_0001>
module attributes {stable_mosaic.version = 11 : i64} {
  func.func @kernel(%arg0: memref<8x1xi32, #tpu.memory_space<vmem>>, %arg1: memref<8x128xf32, #tpu.memory_space<vmem>>, %arg2: memref<8x128xf32, #tpu.memory_space<vmem>>, %arg3: memref<8x1024xf32, #tpu.memory_space<vmem>>, %arg4: memref<1024x256xbf16, #tpu.memory_space<any>>, %arg5: memref<1x256xf32, #tpu.memory_space<vmem>>, %arg6: memref<8x128xf32, #tpu.memory_space<vmem>>, %arg7: memref<4xf32, #tpu.memory_space<smem>>, %arg8: memref<1024x256xbf16, #tpu.memory_space<vmem>>, %arg9: memref<!tpu.dma_semaphore, #tpu.memory_space<semaphore_mem>>) attributes {dimension_semantics = [], scalar_prefetch = 0 : i64, scratch_operands = 2 : i64, tpu.core_type = #tpu.core_type<tc>} {
    tpu.enqueue_dma source(%arg4 : memref<1024x256xbf16, #tpu.memory_space<any>>) target(%arg8 : memref<1024x256xbf16, #tpu.memory_space<vmem>>) target_semaphore(%arg9 : memref<!tpu.dma_semaphore, #tpu.memory_space<semaphore_mem>>)
    %c0 = arith.constant 0 : index
    %c0_0 = arith.constant 0 : index
    %0 = vector.load %arg1[%c0, %c0_0] : memref<8x128xf32, #tpu.memory_space<vmem>>, vector<8x128xf32>
    %1 = tpu.iota {dimensions = array<i32: 1>} : vector<8x128xi32>
    %cst = arith.constant dense<0xFF800000> : vector<8xf32>
    %2 = vector.multi_reduction <maximumf>, %0, %cst [1] : vector<8x128xf32> to vector<8xf32>
    %3 = vector.shape_cast %2 : vector<8xf32> to vector<8x1xf32>
    %4 = vector.broadcast %3 : vector<8x1xf32> to vector<8x128xf32>
    %5 = arith.subf %0, %4 : vector<8x128xf32>
    %6 = math.exp %5 : vector<8x128xf32>
    %cst_1 = arith.constant dense<0.000000e+00> : vector<8xf32>
    %7 = vector.multi_reduction <add>, %6, %cst_1 [1] : vector<8x128xf32> to vector<8xf32>
    %8 = vector.shape_cast %7 : vector<8xf32> to vector<8x1xf32>
    %9 = math.log %8 : vector<8x1xf32>
    %10 = arith.addf %3, %9 : vector<8x1xf32>
    %c0_2 = arith.constant 0 : index
    %c0_3 = arith.constant 0 : index
    %11 = vector.load %arg0[%c0_2, %c0_3] : memref<8x1xi32, #tpu.memory_space<vmem>>, vector<8x1xi32>
    %12 = vector.broadcast %11 : vector<8x1xi32> to vector<8x128xi32>
    %13 = arith.cmpi eq, %1, %12 : vector<8x128xi32>
    %cst_4 = arith.constant 0.000000e+00 : f32
    %14 = vector.broadcast %cst_4 : f32 to vector<8x128xf32>
    %15 = arith.select %13, %0, %14 : vector<8x128xi1>, vector<8x128xf32>
    %cst_5 = arith.constant dense<0.000000e+00> : vector<8xf32>
    %16 = vector.multi_reduction <add>, %15, %cst_5 [1] : vector<8x128xf32> to vector<8xf32>
    %17 = vector.shape_cast %16 : vector<8xf32> to vector<8x1xf32>
    %18 = arith.subf %10, %17 : vector<8x1xf32>
    %19 = vector.shape_cast %18 : vector<8x1xf32> to vector<1x8x1xf32>
    %cst_6 = arith.constant dense<0.000000e+00> : vector<1xf32>
    %20 = vector.multi_reduction <add>, %19, %cst_6 [1, 2] : vector<1x8x1xf32> to vector<1xf32>
    %21 = vector.shape_cast %20 : vector<1xf32> to vector<1x1x1xf32>
    %22 = vector.extract %21[0, 0, 0] : f32 from vector<1x1x1xf32>
    %cst_7 = arith.constant 1.250000e-01 : f32
    %23 = arith.mulf %22, %cst_7 : f32
    %c0_8 = arith.constant 0 : index
    %c0_9 = arith.constant 0 : index
    %24 = vector.load %arg2[%c0_8, %c0_9] : memref<8x128xf32, #tpu.memory_space<vmem>>, vector<8x128xf32>
    %cst_10 = arith.constant 0.333333343 : f32
    %25 = vector.broadcast %cst_10 : f32 to vector<8x128xf32>
    %26 = arith.mulf %24, %25 : vector<8x128xf32>
    %cst_11 = arith.constant dense<0xFF800000> : vector<8xf32>
    %27 = vector.multi_reduction <maximumf>, %26, %cst_11 [1] : vector<8x128xf32> to vector<8xf32>
    %28 = vector.shape_cast %27 : vector<8xf32> to vector<8x1xf32>
    %29 = vector.broadcast %28 : vector<8x1xf32> to vector<8x128xf32>
    %30 = arith.subf %26, %29 : vector<8x128xf32>
    %31 = math.exp %30 : vector<8x128xf32>
    %cst_12 = arith.constant dense<0.000000e+00> : vector<8xf32>
    %32 = vector.multi_reduction <add>, %31, %cst_12 [1] : vector<8x128xf32> to vector<8xf32>
    %33 = vector.shape_cast %32 : vector<8xf32> to vector<8x1xf32>
    %34 = vector.broadcast %28 : vector<8x1xf32> to vector<8x128xf32>
    %35 = arith.subf %26, %34 : vector<8x128xf32>
    %36 = math.log %33 : vector<8x1xf32>
    %37 = vector.broadcast %36 : vector<8x1xf32> to vector<8x128xf32>
    %38 = arith.subf %35, %37 : vector<8x128xf32>
    tpu.wait_dma2 semaphore(%arg9 : memref<!tpu.dma_semaphore, #tpu.memory_space<semaphore_mem>>) src(%arg4 : memref<1024x256xbf16, #tpu.memory_space<any>>) dst(%arg8 : memref<1024x256xbf16, #tpu.memory_space<vmem>>)
    %c0_13 = arith.constant 0 : index
    %c0_14 = arith.constant 0 : index
    %39 = vector.load %arg3[%c0_13, %c0_14] : memref<8x1024xf32, #tpu.memory_space<vmem>>, vector<8x1024xf32>
    %40 = arith.truncf %39 : vector<8x1024xf32> to vector<8x1024xbf16>
    %c0_15 = arith.constant 0 : index
    %c0_16 = arith.constant 0 : index
    %41 = vector.load %arg8[%c0_15, %c0_16] : memref<1024x256xbf16, #tpu.memory_space<vmem>>, vector<1024x256xbf16>
    %cst_17 = arith.constant dense<0.000000e+00> : vector<8x256xf32>
    %42 = tpu.matmul %40, %41, %cst_17 {dimension_numbers = #tpu.dot_dimension_numbers<[1], [0], [0], [1], [0, 0, 1, 1], [], []>} : vector<8x1024xbf16>, vector<1024x256xbf16>, vector<8x256xf32> -> vector<8x256xf32>
    %c0_18 = arith.constant 0 : index
    %c0_19 = arith.constant 0 : index
    %43 = vector.load %arg5[%c0_18, %c0_19] : memref<1x256xf32, #tpu.memory_space<vmem>>, vector<1x256xf32>
    %44 = vector.broadcast %43 : vector<1x256xf32> to vector<8x256xf32>
    %45 = arith.addf %42, %44 : vector<8x256xf32>
    %46 = vector.extract_strided_slice %45 {offsets = [0, 128], sizes = [8, 128], strides = [1, 1]} : vector<8x256xf32> to vector<8x128xf32>
    %c0_20 = arith.constant 0 : index
    %c0_21 = arith.constant 0 : index
    %47 = vector.load %arg6[%c0_20, %c0_21] : memref<8x128xf32, #tpu.memory_space<vmem>>, vector<8x128xf32>
    %48 = arith.subf %47, %46 : vector<8x128xf32>
    %49 = arith.mulf %48, %48 : vector<8x128xf32>
    %50 = vector.shape_cast %49 : vector<8x128xf32> to vector<1x8x128xf32>
    %cst_22 = arith.constant dense<0.000000e+00> : vector<1xf32>
    %51 = vector.multi_reduction <add>, %50, %cst_22 [1, 2] : vector<1x8x128xf32> to vector<1xf32>
    %52 = vector.shape_cast %51 : vector<1xf32> to vector<1x1x1xf32>
    %53 = vector.extract %52[0, 0, 0] : f32 from vector<1x1x1xf32>
    %cst_23 = arith.constant 9.765625E-4 : f32
    %54 = arith.mulf %53, %cst_23 : f32
    %55 = vector.extract_strided_slice %45 {offsets = [0, 0], sizes = [8, 128], strides = [1, 1]} : vector<8x256xf32> to vector<8x128xf32>
    %cst_24 = arith.constant 0.333333343 : f32
    %56 = vector.broadcast %cst_24 : f32 to vector<8x128xf32>
    %57 = arith.mulf %55, %56 : vector<8x128xf32>
    %cst_25 = arith.constant dense<0xFF800000> : vector<8xf32>
    %58 = vector.multi_reduction <maximumf>, %57, %cst_25 [1] : vector<8x128xf32> to vector<8xf32>
    %59 = vector.shape_cast %58 : vector<8xf32> to vector<8x1xf32>
    %60 = vector.broadcast %59 : vector<8x1xf32> to vector<8x128xf32>
    %61 = arith.subf %57, %60 : vector<8x128xf32>
    %62 = math.exp %61 : vector<8x128xf32>
    %cst_26 = arith.constant dense<0.000000e+00> : vector<8xf32>
    %63 = vector.multi_reduction <add>, %62, %cst_26 [1] : vector<8x128xf32> to vector<8xf32>
    %64 = vector.shape_cast %63 : vector<8xf32> to vector<8x1xf32>
    %65 = vector.broadcast %59 : vector<8x1xf32> to vector<8x128xf32>
    %66 = arith.subf %57, %65 : vector<8x128xf32>
    %67 = math.log %64 : vector<8x1xf32>
    %68 = vector.broadcast %67 : vector<8x1xf32> to vector<8x128xf32>
    %69 = arith.subf %66, %68 : vector<8x128xf32>
    %70 = vector.broadcast %64 : vector<8x1xf32> to vector<8x128xf32>
    %71 = arith.divf %62, %70 : vector<8x128xf32>
    %72 = arith.subf %69, %38 : vector<8x128xf32>
    %73 = arith.mulf %71, %72 : vector<8x128xf32>
    %74 = vector.shape_cast %73 : vector<8x128xf32> to vector<1x8x128xf32>
    %cst_27 = arith.constant dense<0.000000e+00> : vector<1xf32>
    %75 = vector.multi_reduction <add>, %74, %cst_27 [1, 2] : vector<1x8x128xf32> to vector<1xf32>
    %76 = vector.shape_cast %75 : vector<1xf32> to vector<1x1x1xf32>
    %77 = vector.extract %76[0, 0, 0] : f32 from vector<1x1x1xf32>
    %cst_28 = arith.constant 0.0087890625 : f32
    %78 = arith.mulf %77, %cst_28 : f32
    %cst_29 = arith.constant 5.000000e-01 : f32
    %79 = arith.mulf %23, %cst_29 : f32
    %cst_30 = arith.constant 5.000000e-01 : f32
    %80 = arith.mulf %78, %cst_30 : f32
    %81 = arith.addf %79, %80 : f32
    %c0_31 = arith.constant 0 : index
    %82 = memref.load %arg7[%c0_31] : memref<4xf32, #tpu.memory_space<smem>>
    memref.store %23, %arg7[%c0_31] : memref<4xf32, #tpu.memory_space<smem>>
    %c1 = arith.constant 1 : index
    %83 = memref.load %arg7[%c1] : memref<4xf32, #tpu.memory_space<smem>>
    memref.store %78, %arg7[%c1] : memref<4xf32, #tpu.memory_space<smem>>
    %c2 = arith.constant 2 : index
    %84 = memref.load %arg7[%c2] : memref<4xf32, #tpu.memory_space<smem>>
    memref.store %54, %arg7[%c2] : memref<4xf32, #tpu.memory_space<smem>>
    %c3 = arith.constant 3 : index
    %85 = memref.load %arg7[%c3] : memref<4xf32, #tpu.memory_space<smem>>
    memref.store %81, %arg7[%c3] : memref<4xf32, #tpu.memory_space<smem>>
    return
  }
}

</mosaic_0001>

<bundles_post_ra>
// kernel: fn.1
= control target key start
LH: loop header
LB: loop body
LE: loop exit
PB: predicated region body
PF: predicated region fallthrough
CT: control target
= control target key end

     0   :  { %s1604_s0 = inlined_call_operand.vmem [shape: s32[8,1], index: 0, kind: input, shape index: {}]   ;;  %s1605_s1 = inlined_call_operand.vmem [shape: f32[8,128], index: 1, kind: input, shape index: {}]   ;;  %s1606_s2 = inlined_call_operand.vmem [shape: f32[8,128], index: 2, kind: input, shape index: {}]   ;;  %s1607_s3 = inlined_call_operand.vmem [shape: f32[8,1024], index: 3, kind: input, shape index: {}]   ;;  %s1608_s4 = inlined_call_operand.hbm [shape: bf16[1024,256], index: 4, kind: input, shape index: {}]   ;;  %s1609_s5 = inlined_call_operand.vmem [shape: f32[1,256], index: 5, kind: input, shape index: {}]   ;;  %s1610_s6 = inlined_call_operand.vmem [shape: f32[8,128], index: 6, kind: input, shape index: {}]   ;;  %s1611_s7 = inlined_call_operand.vmem [shape: f32[4], index: 7, kind: output, shape index: {}]  }
   0x1   :  { %v36_v0 = vld [vmem:[%s1605_s1] sm:$0xff] }
   0x2   :  { %12 = vsyncpa [#allocation5], 0  ;;  %39 = vmax.xlane.f32.xlu0 %v36_v0  ;;  %v1497_v1 = vmov 0   ;;  %v49_v2 = vld [vmem:[%s1604_s0] sm:$0xff]  ;;  %v37_v6 = vlaneseq  ;;  %vm58_vm1 = vcmask 7168   ;;  %s1498_s0 = smov [#allocation2]  }
   0x3   :  { %1254 = vset.pattern.permute.xlu0 %v1497_v1  ;;  %v70_v11 = vld [vmem:[%s1606_s2] sm:$0xff]  ;;  %s32_s2 = sshll.u32 %s1498_s0, 4  ;;  %s33_s2 = int_to_ptr.vmem [resolvable:$true] %s32_s2 }
   0x4   :  { %v38_v7 = vand.u32 127, %v37_v6  ;;  %v71_v12 = vmul.f32 0.33333334, %v70_v11  ;;  %s1469_s29 = scalar_lea.vmem %s33_s2, 16384  ;;  %p1474_p1 = scmp.lt.s32.totalorder %s33_s2, %s33_s2 }
   0x5   :  { %p1470_p0 = scmp.ne.s32.totalorder %s33_s2, %s1469_s29  ;;  %p1475_p2 = scmp.lt.s32.totalorder %s1469_s29, %s1469_s29 }
   0x7   :  { %p1476_p3 = por %p1475_p2, %p1474_p1 }
   0x9   :  { %p1477_p4 = pnand %p1476_p3, %p1470_p0 }
  0x18   :  { %51 = vperm.xlu0 %1254, %v49_v2  }
  0x8b   :  { %v40_v3 = vpop.xlane.xlu0 %39 }
  0x8c   :  { %v41_v4 = vsub.f32 %v36_v0, %v40_v3 }
  0x8e   :  { %v42_v5 = vmul.f32 1.442695, %v41_v4 }
  0x90   :  { %1255 = vpow2.f32 %v42_v5 }
  0x93   :  { %v52_v8 = vpop.permute.xlu0 %51 }
  0x94   :  { %vm53_vm0 = vcmp.eq.s32.totalorder %v38_v7, %v52_v8 }
  0x95   :  { %v54_v10 = vsel %vm53_vm0, %v36_v0, 0.0 }
  0x9d   :  { %v1256_v9 = vpop.eup %1255 }
  0x9e   :  { %44 = vadd.xlane.f32.xlu1 %v1256_v9 }
  0xa2   :  { %55 = vadd.xlane.f32.xlu1 %v54_v10 }
  0xa6   :  { %72 = vmax.xlane.f32.xlu1 %v71_v12 }
 0x127   :  { %v45_v13 = vpop.xlane.xlu1 %44 }
 0x128   :  { %1257 = vlog2.f32 %v45_v13 }
 0x12b   :  { %v56_v14 = vpop.xlane.xlu1 %55 }
 0x12f   :  { %v73_v15 = vpop.xlane.xlu1 %72 }
 0x130   :  { %v1550_v16 = vsub.f32 %v71_v12, %v73_v15 }
 0x132   :  { %v75_v17 = vmul.f32 1.442695, %v1550_v16 }
 0x134   :  { %1259 = vpow2.f32 %v75_v17 }
 0x135   :  { %v1258_v18 = vpop.eup %1257 }
 0x136   :  { %v47_v19 = vmul.f32 0.6931472, %v1258_v18 }
 0x138   :  { %v48_v20 = vadd.f32 %v47_v19, %v40_v3 }
 0x13a   :  { %v57_v21 = vsub.f32 %v48_v20, %v56_v14 }
 0x13c   :  { %v59_v22 = vsel %vm58_vm1, %v57_v21, 0.0 }
 0x13d   :  { %60 = vadd.xlane.f32.xlu1 %v59_v22 }
 0x141   :  { %v1260_v23 = vpop.eup %1259 }
 0x142   :  { %77 = vadd.xlane.f32.xlu1 %v1260_v23 }
 0x143   :  { %1480 = shalt.err (!%p1477_p4)  }
 0x144   :  { %35 = dma.hbm_to_vmem [thread:$0]  %s1608_s4, 16384, %s33_s2, [#allocation3] }
 0x1c6   :  { %v61_v24 = vpop.xlane.xlu1 %60 }
 0x1c7   :  { %v62_v25 = vrot.slane %v61_v24, 4 }
 0x1c9   :  { %v63_v26 = vadd.f32 %v62_v25, %v61_v24 }
 0x1cb   :  { %v64_v27 = vrot.slane %v63_v26, 2  ;;  %v78_v28 = vpop.xlane.xlu1 %77 }
 0x1cc   :  { %1261 = vlog2.f32 %v78_v28 }
 0x1cd   :  { %v65_v29 = vadd.f32 %v64_v27, %v63_v26 }
 0x1cf   :  { %v66_v30 = vrot.slane %v65_v29, 1 }
 0x1d1   :  { %v67_v31 = vadd.f32 %v66_v30, %v65_v29 }
 0x1d3   :  { %1245 = vpush %v67_v31 }
 0x1d9   :  { %v1262_v32 = vpop.eup %1261 }
 0x1da   :  { %v1556_v33 = vmul.f32 0.6931472, %v1262_v32 }
 0x1dc   :  { %v81_v34 = vsub.f32 %v1550_v16, %v1556_v33 }
 0x204   :  { %s1560_s9 = spop %1245 }
 0x205   :  { %s69_s4 = smul.f32 0.125, %s1560_s9 }
 0x206   :  { %1493 = dma.done.wait [#allocation3], 16384 }
 0x207   :  { %1494 = vsyncadd [#allocation3], 4294950912  ;;  %1088 = sst [smem:[#allocation4]] %s69_s4  ;;  %v1263_v35 = vld [vmem:[#allocation2 + $0x74] ss:$8 sps:$4 sm:$0xff]   ;;  %v87_v19 = vld [vmem:[%s1607_s3 + $0x8] sm:$0xff] }
 0x208   :  { %v1265_v36 = vld [vmem:[#allocation2 + $0x174] ss:$8 sps:$4 sm:$0xff]   ;;  %882 = vmatprep.subr.bf16.mxu0 %v1263_v35  ;;  %v1267_v37 = vld [vmem:[#allocation2 + $0x70] ss:$8 sps:$4 sm:$0xff]   ;;  %v1269_v39 = vld [vmem:[#allocation2 + $0x64] ss:$8 sps:$4 sm:$0xff]   ;;  %v95_v22 = vpack.c.bf16 %v87_v19, %v87_v19 }
 0x209   :  { %v1268_v38 = vld [vmem:[#allocation2 + $0x170] ss:$8 sps:$4 sm:$0xff]   ;;  %923 = vmatprep.subr.bf16.mxu1 %v1265_v36  ;;  %883 = vmatpush1.bf16.msra.mxu0 %v1267_v37  ;;  %v1271_v40 = vld [vmem:[#allocation2 + $0x164] ss:$8 sps:$4 sm:$0xff]   ;;  %v1273_v41 = vld [vmem:[#allocation2 + $0x60] ss:$8 sps:$4 sm:$0xff]  }
 0x20a   :  { %924 = vmatpush1.bf16.msra.mxu1 %v1268_v38  ;;  %884 = vmatprep.subr.bf16.mxu0 %v1269_v39  ;;  %v1274_v42 = vld [vmem:[#allocation2 + $0x160] ss:$8 sps:$4 sm:$0xff]   ;;  %v1275_v43 = vld [vmem:[#allocation2 + $0x54] ss:$8 sps:$4 sm:$0xff]   ;;  %v1279_v45 = vld [vmem:[#allocation2 + $0x50] ss:$8 sps:$4 sm:$0xff]  }
 0x20b   :  { %925 = vmatprep.subr.bf16.mxu1 %v1271_v40  ;;  %v1277_v44 = vld [vmem:[#allocation2 + $0x154] ss:$8 sps:$4 sm:$0xff]   ;;  %v1280_v46 = vld [vmem:[#allocation2 + $0x150] ss:$8 sps:$4 sm:$0xff]   ;;  %v1281_v47 = vld [vmem:[#allocation2 + $0x44] ss:$8 sps:$4 sm:$0xff]   ;;  %914 = vmatprep.mubr.bf16.mxu0 %v95_v22 }
 0x20c   :  { %v1283_v48 = vld [vmem:[#allocation2 + $0x144] ss:$8 sps:$4 sm:$0xff]   ;;  %v1285_v49 = vld [vmem:[#allocation2 + $0x40] ss:$8 sps:$4 sm:$0xff]   ;;  %v1287_v51 = vld [vmem:[#allocation2 + $0x34] ss:$8 sps:$4 sm:$0xff]  }
 0x20d   :  { %885 = vmatpush1.bf16.msra.mxu0 %v1273_v41  ;;  %v1286_v50 = vld [vmem:[#allocation2 + $0x140] ss:$8 sps:$4 sm:$0xff]   ;;  %v1289_v52 = vld [vmem:[#allocation2 + $0x134] ss:$8 sps:$4 sm:$0xff]   ;;  %v1291_v53 = vld [vmem:[#allocation2 + $0x30] ss:$8 sps:$4 sm:$0xff]  }
 0x20e   :  { %926 = vmatpush1.bf16.msra.mxu1 %v1274_v42  ;;  %886 = vmatprep.subr.bf16.mxu0 %v1275_v43  ;;  %v1292_v54 = vld [vmem:[#allocation2 + $0x130] ss:$8 sps:$4 sm:$0xff]   ;;  %v1293_v55 = vld [vmem:[#allocation2 + $0x24] ss:$8 sps:$4 sm:$0xff]   ;;  %v1297_v57 = vld [vmem:[#allocation2 + $0x20] ss:$8 sps:$4 sm:$0xff]  }
 0x20f   :  { %927 = vmatprep.subr.bf16.mxu1 %v1277_v44  ;;  %v1295_v56 = vld [vmem:[#allocation2 + $0x124] ss:$8 sps:$4 sm:$0xff]   ;;  %v1298_v58 = vld [vmem:[#allocation2 + $0x120] ss:$8 sps:$4 sm:$0xff]   ;;  %v1299_v59 = vld [vmem:[#allocation2 + $0x14] ss:$8 sps:$4 sm:$0xff]  }
 0x210   :  { %v1301_v60 = vld [vmem:[#allocation2 + $0x114] ss:$8 sps:$4 sm:$0xff]   ;;  %v1303_v61 = vld [vmem:[#allocation2 + $0x10] ss:$8 sps:$4 sm:$0xff]   ;;  %v1305_v63 = vld [vmem:[#allocation2 + $0x4] ss:$8 sps:$4 sm:$0xff]  }
 0x211   :  { %887 = vmatpush1.bf16.msra.mxu0 %v1279_v45  ;;  %v1304_v62 = vld [vmem:[#allocation2 + $0x110] ss:$8 sps:$4 sm:$0xff]   ;;  %v1307_v0 = vld [vmem:[#allocation2 + $0x104] ss:$8 sps:$4 sm:$0xff]   ;;  %v1309_v1 = vld [vmem:[#allocation2] ss:$8 sps:$4 sm:$0xff]  }
 0x212   :  { %928 = vmatpush1.bf16.msra.mxu1 %v1280_v46  ;;  %888 = vmatprep.subr.bf16.mxu0 %v1281_v47  ;;  %v1310_v2 = vld [vmem:[#allocation2 + $0x100] ss:$8 sps:$4 sm:$0xff]   ;;  %v1311_v3 = vld [vmem:[#allocation2 + $0xf4] ss:$8 sps:$4 sm:$0xff]   ;;  %v1315_v5 = vld [vmem:[#allocation2 + $0xf0] ss:$8 sps:$4 sm:$0xff]  }
 0x213   :  { %929 = vmatprep.subr.bf16.mxu1 %v1283_v48  ;;  %v1313_v4 = vld [vmem:[#allocation2 + $0x1f4] ss:$8 sps:$4 sm:$0xff]   ;;  %v1316_v7 = vld [vmem:[#allocation2 + $0x1f0] ss:$8 sps:$4 sm:$0xff]   ;;  %v1317_v8 = vld [vmem:[#allocation2 + $0xe4] ss:$8 sps:$4 sm:$0xff]  }
 0x214   :  { %v1319_v9 = vld [vmem:[#allocation2 + $0x1e4] ss:$8 sps:$4 sm:$0xff]   ;;  %v1321_v10 = vld [vmem:[#allocation2 + $0xe0] ss:$8 sps:$4 sm:$0xff]   ;;  %v1323_v12 = vld [vmem:[#allocation2 + $0xd4] ss:$8 sps:$4 sm:$0xff]  }
 0x215   :  { %889 = vmatpush1.bf16.msra.mxu0 %v1285_v49  ;;  %v1322_v11 = vld [vmem:[#allocation2 + $0x1e0] ss:$8 sps:$4 sm:$0xff]   ;;  %v1325_v13 = vld [vmem:[#allocation2 + $0x1d4] ss:$8 sps:$4 sm:$0xff]   ;;  %v1327_v14 = vld [vmem:[#allocation2 + $0xd0] ss:$8 sps:$4 sm:$0xff]  }
 0x216   :  { %930 = vmatpush1.bf16.msra.mxu1 %v1286_v50  ;;  %890 = vmatprep.subr.bf16.mxu0 %v1287_v51  ;;  %v1328_v15 = vld [vmem:[#allocation2 + $0x1d0] ss:$8 sps:$4 sm:$0xff]   ;;  %v1329_v17 = vld [vmem:[#allocation2 + $0xc4] ss:$8 sps:$4 sm:$0xff]   ;;  %v1333_v20 = vld [vmem:[#allocation2 + $0xc0] ss:$8 sps:$4 sm:$0xff]  }
 0x217   :  { %931 = vmatprep.subr.bf16.mxu1 %v1289_v52  ;;  %v1331_v18 = vld [vmem:[#allocation2 + $0x1c4] ss:$8 sps:$4 sm:$0xff]   ;;  %v1334_v21 = vld [vmem:[#allocation2 + $0x1c0] ss:$8 sps:$4 sm:$0xff]   ;;  %v89_v23 = vld [vmem:[%s1607_s3 + $0x18] sm:$0xff]  ;;  %s1084_s0 = smul.f32 0.5, %s69_s4 }
 0x218   :  { %v1335_v24 = vld [vmem:[#allocation2 + $0xb4] ss:$8 sps:$4 sm:$0xff]   ;;  %v97_v25 = vpack.c.bf16 %v89_v23, %v89_v23  ;;  %v1339_v27 = vld [vmem:[#allocation2 + $0xb0] ss:$8 sps:$4 sm:$0xff]   ;;  %v1341_v29 = vld [vmem:[#allocation2 + $0xa4] ss:$8 sps:$4 sm:$0xff]  }
 0x219   :  { %891 = vmatpush1.bf16.msra.mxu0 %v1291_v53  ;;  %v1337_v26 = vld [vmem:[#allocation2 + $0x1b4] ss:$8 sps:$4 sm:$0xff]   ;;  %v1340_v28 = vld [vmem:[#allocation2 + $0x1b0] ss:$8 sps:$4 sm:$0xff]   ;;  %v1343_v30 = vld [vmem:[#allocation2 + $0x1a4] ss:$8 sps:$4 sm:$0xff]  }
 0x21a   :  { %932 = vmatpush1.bf16.msra.mxu1 %v1292_v54  ;;  %892 = vmatprep.subr.bf16.mxu0 %v1293_v55  ;;  %v1345_v31 = vld [vmem:[#allocation2 + $0xa0] ss:$8 sps:$4 sm:$0xff]   ;;  %v1347_v35 = vld [vmem:[#allocation2 + $0x94] ss:$8 sps:$4 sm:$0xff]   ;;  %v1351_v37 = vld [vmem:[#allocation2 + $0x90] ss:$8 sps:$4 sm:$0xff]  }
 0x21b   :  { %933 = vmatprep.subr.bf16.mxu1 %v1295_v56  ;;  %955 = vmatprep.mubr.bf16.mxu1 %v97_v25  ;;  %v1346_v32 = vld [vmem:[#allocation2 + $0x1a0] ss:$8 sps:$4 sm:$0xff]   ;;  %v1349_v36 = vld [vmem:[#allocation2 + $0x194] ss:$8 sps:$4 sm:$0xff]   ;;  %v1352_v38 = vld [vmem:[#allocation2 + $0x190] ss:$8 sps:$4 sm:$0xff]  }
 0x21c   :  { %v1353_v39 = vld [vmem:[#allocation2 + $0x84] ss:$8 sps:$4 sm:$0xff]   ;;  %v1357_v41 = vld [vmem:[#allocation2 + $0x80] ss:$8 sps:$4 sm:$0xff]   ;;  %v88_v44 = vld [vmem:[%s1607_s3 + $0x10] sm:$0xff]  ;;  %s1101_s8 = sshll.u32 %s1611_s7, 4  ;;  %s1102_s8 = int_to_ptr.vmem [resolvable:$true] %s1101_s8 }
 0x21d   :  { %893 = vmatpush1.bf16.msra.mxu0 %v1297_v57  ;;  %v1355_v40 = vld [vmem:[#allocation2 + $0x184] ss:$8 sps:$4 sm:$0xff]   ;;  %v1358_v42 = vld [vmem:[#allocation2 + $0x180] ss:$8 sps:$4 sm:$0xff]   ;;  %v1361_v45 = vld [vmem:[#allocation2 + $0x274] ss:$8 sps:$4 sm:$0xff]   ;;  %v96_v48 = vpack.c.bf16 %v88_v44, %v88_v44  ;;  %p1486_p6 = scmp.lt.s32.totalorder %s1102_s8, %s1102_s8 }
 0x21e   :  { %934 = vmatpush1.bf16.msra.mxu1 %v1298_v58  ;;  %894 = vmatprep.subr.bf16.mxu0 %v1299_v59  ;;  %v86_v43 = vld [vmem:[%s1607_s3] sm:$0xff]  ;;  %v1364_v46 = vld [vmem:[#allocation2 + $0x374] ss:$8 sps:$4 sm:$0xff]   ;;  %v1359_v49 = vld [vmem:[#allocation2 + $0x270] ss:$8 sps:$4 sm:$0xff]   ;;  %s1481_s12 = scalar_lea.vmem %s1102_s8, 16 }
 0x21f   :  { %935 = vmatprep.subr.bf16.mxu1 %v1301_v60  ;;  %v94_v47 = vpack.c.bf16 %v86_v43, %v86_v43  ;;  %v1362_v50 = vld [vmem:[#allocation2 + $0x370] ss:$8 sps:$4 sm:$0xff]   ;;  %v1367_v51 = vld [vmem:[#allocation2 + $0x264] ss:$8 sps:$4 sm:$0xff]   ;;  %v1365_v53 = vld [vmem:[#allocation2 + $0x260] ss:$8 sps:$4 sm:$0xff]   ;;  %p1482_p5 = scmp.ne.s32.totalorder %s1102_s8, %s1481_s12  ;;  %p1487_p7 = scmp.lt.s32.totalorder %s1481_s12, %s1481_s12 }
 0x220   :  { %v1370_v52 = vld [vmem:[#allocation2 + $0x364] ss:$8 sps:$4 sm:$0xff]   ;;  %v1368_v54 = vld [vmem:[#allocation2 + $0x360] ss:$8 sps:$4 sm:$0xff]   ;;  %v1373_v55 = vld [vmem:[#allocation2 + $0x254] ss:$8 sps:$4 sm:$0xff]  }
 0x221   :  { %895 = vmatpush1.bf16.msra.mxu0 %v1303_v61  ;;  %v1376_v56 = vld [vmem:[#allocation2 + $0x354] ss:$8 sps:$4 sm:$0xff]   ;;  %v1371_v57 = vld [vmem:[#allocation2 + $0x250] ss:$8 sps:$4 sm:$0xff]   ;;  %v1379_v59 = vld [vmem:[#allocation2 + $0x244] ss:$8 sps:$4 sm:$0xff]   ;;  %p1488_p8 = por %p1487_p7, %p1486_p6 }
 0x222   :  { %936 = vmatpush1.bf16.msra.mxu1 %v1304_v62  ;;  %896 = vmatprep.subr.bf16.mxu0 %v1305_v63  ;;  %v1374_v58 = vld [vmem:[#allocation2 + $0x350] ss:$8 sps:$4 sm:$0xff]   ;;  %v1382_v60 = vld [vmem:[#allocation2 + $0x344] ss:$8 sps:$4 sm:$0xff]   ;;  %v1377_v61 = vld [vmem:[#allocation2 + $0x240] ss:$8 sps:$4 sm:$0xff]  }
 0x223   :  { %937 = vmatprep.subr.bf16.mxu1 %v1307_v0  ;;  %v1380_v62 = vld [vmem:[#allocation2 + $0x340] ss:$8 sps:$4 sm:$0xff]   ;;  %v1385_v63 = vld [vmem:[#allocation2 + $0x234] ss:$8 sps:$4 sm:$0xff]   ;;  %v1407_v23 = vld [vmem:[#allocation2 + $0x2f0] ss:$8 sps:$4 sm:$0xff]   ;;  %p1489_p9 = pnand %p1488_p8, %p1482_p5 }
 0x224   :  { %v1388_v0 = vld [vmem:[#allocation2 + $0x334] ss:$8 sps:$4 sm:$0xff]   ;;  %v1401_v19 = vld [vmem:[#allocation2 + $0x200] ss:$8 sps:$4 sm:$0xff]   ;;  %v1415_v25 = vld [vmem:[#allocation2 + $0x2e4] ss:$8 sps:$4 sm:$0xff]  }
 0x225   :  { %897 = vmatpush1.bf16.msra.mxu0 %v1309_v1  ;;  %v1383_v1 = vld [vmem:[#allocation2 + $0x230] ss:$8 sps:$4 sm:$0xff]   ;;  %v1412_v22 = vld [vmem:[#allocation2 + $0x3f4] ss:$8 sps:$4 sm:$0xff]   ;;  %v1439_v43 = vld [vmem:[#allocation2 + $0x2a4] ss:$8 sps:$4 sm:$0xff]  }
 0x226   :  { %938 = vmatpush1.bf16.msra.mxu1 %v1310_v2  ;;  %898 = vmatprep.subr.bf16.mxu0 %v1311_v3  ;;  %v1386_v2 = vld [vmem:[#allocation2 + $0x330] ss:$8 sps:$4 sm:$0xff]   ;;  %v1391_v3 = vld [vmem:[#allocation2 + $0x224] ss:$8 sps:$4 sm:$0xff]  }
 0x227   :  { %939 = vmatprep.subr.bf16.mxu1 %v1313_v4  ;;  %v1394_v4 = vld [vmem:[#allocation2 + $0x324] ss:$8 sps:$4 sm:$0xff]  }
 0x228   :  { %v1442_v44 = vld [vmem:[#allocation2 + $0x3a4] ss:$8 sps:$4 sm:$0xff]  }
 0x229   :  { %899 = vmatpush2.bf16.msra.mxu0 %v1315_v5  ;;  %v1389_v5 = vld [vmem:[#allocation2 + $0x220] ss:$8 sps:$4 sm:$0xff]  }
 0x22a   :  { %940 = vmatpush2.bf16.msra.mxu1 %v1316_v7  ;;  %900 = vmatprep.subr.bf16.mxu0 %v1317_v8  ;;  %v1392_v7 = vld [vmem:[#allocation2 + $0x320] ss:$8 sps:$4 sm:$0xff]   ;;  %v1397_v8 = vld [vmem:[#allocation2 + $0x214] ss:$8 sps:$4 sm:$0xff]  }
 0x22b   :  { %941 = vmatprep.subr.bf16.mxu1 %v1319_v9  ;;  %v1400_v9 = vld [vmem:[#allocation2 + $0x314] ss:$8 sps:$4 sm:$0xff]  }
 0x22d   :  { %901 = vmatpush2.bf16.msra.mxu0 %v1321_v10  ;;  %v91_v10 = vld [vmem:[%s1607_s3 + $0x28] sm:$0xff] }
 0x22e   :  { %942 = vmatpush2.bf16.msra.mxu1 %v1322_v11  ;;  %902 = vmatprep.subr.bf16.mxu0 %v1323_v12  ;;  %v99_v11 = vpack.c.bf16 %v91_v10, %v91_v10  ;;  %v93_v12 = vld [vmem:[%s1607_s3 + $0x38] sm:$0xff] }
 0x22f   :  { %943 = vmatprep.subr.bf16.mxu1 %v1325_v13  ;;  %v1395_v13 = vld [vmem:[#allocation2 + $0x210] ss:$8 sps:$4 sm:$0xff]  }
 0x231   :  { %903 = vmatpush2.bf16.msra.mxu0 %v1327_v14  ;;  %v1398_v14 = vld [vmem:[#allocation2 + $0x310] ss:$8 sps:$4 sm:$0xff]  }
 0x232   :  { %944 = vmatpush2.bf16.msra.mxu1 %v1328_v15  ;;  %904 = vmatprep.subr.bf16.mxu0 %v1329_v17  ;;  %v101_v15 = vpack.c.bf16 %v93_v12, %v93_v12  ;;  %v1403_v17 = vld [vmem:[#allocation2 + $0x204] ss:$8 sps:$4 sm:$0xff]  }
 0x233   :  { %945 = vmatprep.subr.bf16.mxu1 %v1331_v18  ;;  %v1406_v18 = vld [vmem:[#allocation2 + $0x304] ss:$8 sps:$4 sm:$0xff]  }
 0x235   :  { %905 = vmatpush2.bf16.msra.mxu0 %v1333_v20  ;;  %v1404_v20 = vld [vmem:[#allocation2 + $0x300] ss:$8 sps:$4 sm:$0xff]  }
 0x236   :  { %946 = vmatpush2.bf16.msra.mxu1 %v1334_v21  ;;  %906 = vmatprep.subr.bf16.mxu0 %v1335_v24  ;;  %v1409_v21 = vld [vmem:[#allocation2 + $0x2f4] ss:$8 sps:$4 sm:$0xff]   ;;  %v1410_v24 = vld [vmem:[#allocation2 + $0x3f0] ss:$8 sps:$4 sm:$0xff]  }
 0x237   :  { %947 = vmatprep.subr.bf16.mxu1 %v1337_v26  ;;  %v1418_v26 = vld [vmem:[#allocation2 + $0x3e4] ss:$8 sps:$4 sm:$0xff]  }
 0x239   :  { %907 = vmatpush2.bf16.msra.mxu0 %v1339_v27  ;;  %v1413_v27 = vld [vmem:[#allocation2 + $0x2e0] ss:$8 sps:$4 sm:$0xff]  }
 0x23a   :  { %948 = vmatpush2.bf16.msra.mxu1 %v1340_v28  ;;  %908 = vmatprep.subr.bf16.mxu0 %v1341_v29  ;;  %v1416_v28 = vld [vmem:[#allocation2 + $0x3e0] ss:$8 sps:$4 sm:$0xff]   ;;  %v1421_v29 = vld [vmem:[#allocation2 + $0x2d4] ss:$8 sps:$4 sm:$0xff]  }
 0x23b   :  { %949 = vmatprep.subr.bf16.mxu1 %v1343_v30  ;;  %v1424_v30 = vld [vmem:[#allocation2 + $0x3d4] ss:$8 sps:$4 sm:$0xff]  }
 0x23d   :  { %909 = vmatpush2.bf16.msra.mxu0 %v1345_v31  ;;  %v1419_v31 = vld [vmem:[#allocation2 + $0x2d0] ss:$8 sps:$4 sm:$0xff]  }
 0x23e   :  { %950 = vmatpush2.bf16.msra.mxu1 %v1346_v32  ;;  %910 = vmatprep.subr.bf16.mxu0 %v1347_v35  ;;  %v1422_v32 = vld [vmem:[#allocation2 + $0x3d0] ss:$8 sps:$4 sm:$0xff]   ;;  %v1427_v35 = vld [vmem:[#allocation2 + $0x2c4] ss:$8 sps:$4 sm:$0xff]  }
 0x23f   :  { %951 = vmatprep.subr.bf16.mxu1 %v1349_v36  ;;  %v1430_v36 = vld [vmem:[#allocation2 + $0x3c4] ss:$8 sps:$4 sm:$0xff]  }
 0x241   :  { %911 = vmatpush2.bf16.msra.mxu0 %v1351_v37  ;;  %v1425_v37 = vld [vmem:[#allocation2 + $0x2c0] ss:$8 sps:$4 sm:$0xff]  }
 0x242   :  { %952 = vmatpush2.bf16.msra.mxu1 %v1352_v38  ;;  %912 = vmatprep.subr.bf16.mxu0 %v1353_v39  ;;  %v1428_v38 = vld [vmem:[#allocation2 + $0x3c0] ss:$8 sps:$4 sm:$0xff]   ;;  %v1433_v39 = vld [vmem:[#allocation2 + $0x2b4] ss:$8 sps:$4 sm:$0xff]  }
 0x243   :  { %953 = vmatprep.subr.bf16.mxu1 %v1355_v40  ;;  %v1436_v40 = vld [vmem:[#allocation2 + $0x3b4] ss:$8 sps:$4 sm:$0xff]  }
 0x245   :  { %913 = vmatpush2.bf16.msra.mxu0 %v1357_v41  ;;  %v1431_v41 = vld [vmem:[#allocation2 + $0x2b0] ss:$8 sps:$4 sm:$0xff]  }
 0x246   :  { %954 = vmatpush2.bf16.msra.mxu1 %v1358_v42  ;;  %964 = vmatprep.subr.bf16.mxu0 %v1361_v45  ;;  %v1434_v42 = vld [vmem:[#allocation2 + $0x3b0] ss:$8 sps:$4 sm:$0xff]   ;;  %v1437_v45 = vld [vmem:[#allocation2 + $0x2a0] ss:$8 sps:$4 sm:$0xff]  }
 0x247   :  { %1005 = vmatprep.subr.bf16.mxu1 %v1364_v46  ;;  %v1440_v46 = vld [vmem:[#allocation2 + $0x3a0] ss:$8 sps:$4 sm:$0xff]  }
 0x248   :  { %915 = vmatmul.mubr.bf16.vlgmr.msra.gmra.mxu0 %v94_v47  ;;  %v1445_v47 = vld [vmem:[#allocation2 + $0x294] ss:$8 sps:$4 sm:$0xff]  }
 0x249   :  { %956 = vmatmul.mubr.bf16.vlgmr.msra.gmra.mxu1 %v96_v48  ;;  %965 = vmatpush1.bf16.msra.mxu0 %v1359_v49  ;;  %v1448_v48 = vld [vmem:[#allocation2 + $0x394] ss:$8 sps:$4 sm:$0xff]   ;;  %v1443_v49 = vld [vmem:[#allocation2 + $0x290] ss:$8 sps:$4 sm:$0xff]  }
 0x24a   :  { %1006 = vmatpush1.bf16.msra.mxu1 %v1362_v50  ;;  %966 = vmatprep.subr.bf16.mxu0 %v1367_v51  ;;  %v1446_v50 = vld [vmem:[#allocation2 + $0x390] ss:$8 sps:$4 sm:$0xff]   ;;  %v1451_v51 = vld [vmem:[#allocation2 + $0x284] ss:$8 sps:$4 sm:$0xff]  }
 0x24b   :  { %1007 = vmatprep.subr.bf16.mxu1 %v1370_v52  ;;  %996 = vmatprep.mubr.bf16.mxu0 %v99_v11  ;;  %v1454_v52 = vld [vmem:[#allocation2 + $0x384] ss:$8 sps:$4 sm:$0xff]  }
 0x24c   :  { %1037 = vmatprep.mubr.bf16.mxu1 %v101_v15 }
 0x24d   :  { %967 = vmatpush1.bf16.msra.mxu0 %v1365_v53  ;;  %v1449_v53 = vld [vmem:[#allocation2 + $0x280] ss:$8 sps:$4 sm:$0xff]  }
 0x24e   :  { %1008 = vmatpush1.bf16.msra.mxu1 %v1368_v54  ;;  %968 = vmatprep.subr.bf16.mxu0 %v1373_v55  ;;  %v1452_v54 = vld [vmem:[#allocation2 + $0x380] ss:$8 sps:$4 sm:$0xff]  }
 0x24f   :  { %1009 = vmatprep.subr.bf16.mxu1 %v1376_v56  ;;  %v90_v55 = vld [vmem:[%s1607_s3 + $0x20] sm:$0xff]  ;;  %v92_v56 = vld [vmem:[%s1607_s3 + $0x30] sm:$0xff] }
 0x251   :  { %969 = vmatpush1.bf16.msra.mxu0 %v1371_v57  ;;  %v98_v57 = vpack.c.bf16 %v90_v55, %v90_v55 }
 0x252   :  { %1010 = vmatpush1.bf16.msra.mxu1 %v1374_v58  ;;  %970 = vmatprep.subr.bf16.mxu0 %v1379_v59  ;;  %v100_v58 = vpack.c.bf16 %v92_v56, %v92_v56 }
 0x253   :  { %1011 = vmatprep.subr.bf16.mxu1 %v1382_v60 }
 0x255   :  { %971 = vmatpush1.bf16.msra.mxu0 %v1377_v61 }
 0x256   :  { %1012 = vmatpush1.bf16.msra.mxu1 %v1380_v62  ;;  %972 = vmatprep.subr.bf16.mxu0 %v1385_v63 }
 0x257   :  { %1013 = vmatprep.subr.bf16.mxu1 %v1388_v0 }
 0x259   :  { %973 = vmatpush1.bf16.msra.mxu0 %v1383_v1 }
 0x25a   :  { %1014 = vmatpush1.bf16.msra.mxu1 %v1386_v2  ;;  %974 = vmatprep.subr.bf16.mxu0 %v1391_v3  ;;  %v233_v3 = vshrl.u32 %v37_v6, 7 }
 0x25b   :  { %1015 = vmatprep.subr.bf16.mxu1 %v1394_v4 }
 0x25c   :  { %v234_v4 = vsub.s32 0, %v233_v3 }
 0x25d   :  { %975 = vmatpush1.bf16.msra.mxu0 %v1389_v5  ;;  %v230_v5 = vld [vmem:[%s1609_s5] sm:$0x3] }
 0x25e   :  { %1016 = vmatpush1.bf16.msra.mxu1 %v1392_v7  ;;  %976 = vmatprep.subr.bf16.mxu0 %v1397_v8  ;;  %v238_v7 = vsub.s32 1, %v233_v3  ;;  %v235_v8 = vrot.slane %v230_v5, %v234_v4 }
 0x25f   :  { %1017 = vmatprep.subr.bf16.mxu1 %v1400_v9 }
 0x260   :  { %v239_v9 = vrot.slane %v230_v5, %v238_v7 }
 0x261   :  { %977 = vmatpush1.bf16.msra.mxu0 %v1395_v13 }
 0x262   :  { %1018 = vmatpush1.bf16.msra.mxu1 %v1398_v14  ;;  %978 = vmatprep.subr.bf16.mxu0 %v1403_v17 }
 0x263   :  { %1019 = vmatprep.subr.bf16.mxu1 %v1406_v18 }
 0x265   :  { %979 = vmatpush1.bf16.msra.mxu0 %v1401_v19 }
 0x266   :  { %1020 = vmatpush1.bf16.msra.mxu1 %v1404_v20  ;;  %980 = vmatprep.subr.bf16.mxu0 %v1409_v21 }
 0x267   :  { %1021 = vmatprep.subr.bf16.mxu1 %v1412_v22 }
 0x269   :  { %981 = vmatpush2.bf16.msra.mxu0 %v1407_v23  ;;  %v1046_v23 = vld [vmem:[%s1610_s6] sm:$0xff] }
 0x26a   :  { %1022 = vmatpush2.bf16.msra.mxu1 %v1410_v24  ;;  %982 = vmatprep.subr.bf16.mxu0 %v1415_v25 }
 0x26b   :  { %1023 = vmatprep.subr.bf16.mxu1 %v1418_v26 }
 0x26d   :  { %983 = vmatpush2.bf16.msra.mxu0 %v1413_v27 }
 0x26e   :  { %1024 = vmatpush2.bf16.msra.mxu1 %v1416_v28  ;;  %984 = vmatprep.subr.bf16.mxu0 %v1421_v29 }
 0x26f   :  { %1025 = vmatprep.subr.bf16.mxu1 %v1424_v30 }
 0x271   :  { %985 = vmatpush2.bf16.msra.mxu0 %v1419_v31 }
 0x272   :  { %1026 = vmatpush2.bf16.msra.mxu1 %v1422_v32  ;;  %986 = vmatprep.subr.bf16.mxu0 %v1427_v35 }
 0x273   :  { %1027 = vmatprep.subr.bf16.mxu1 %v1430_v36 }
 0x275   :  { %987 = vmatpush2.bf16.msra.mxu0 %v1425_v37 }
 0x276   :  { %1028 = vmatpush2.bf16.msra.mxu1 %v1428_v38  ;;  %988 = vmatprep.subr.bf16.mxu0 %v1433_v39 }
 0x277   :  { %1029 = vmatprep.subr.bf16.mxu1 %v1436_v40 }
 0x279   :  { %989 = vmatpush2.bf16.msra.mxu0 %v1431_v41 }
 0x27a   :  { %1030 = vmatpush2.bf16.msra.mxu1 %v1434_v42  ;;  %990 = vmatprep.subr.bf16.mxu0 %v1439_v43 }
 0x27b   :  { %1031 = vmatprep.subr.bf16.mxu1 %v1442_v44 }
 0x27d   :  { %991 = vmatpush2.bf16.msra.mxu0 %v1437_v45 }
 0x27e   :  { %1032 = vmatpush2.bf16.msra.mxu1 %v1440_v46  ;;  %992 = vmatprep.subr.bf16.mxu0 %v1445_v47 }
 0x27f   :  { %1033 = vmatprep.subr.bf16.mxu1 %v1448_v48 }
 0x281   :  { %993 = vmatpush2.bf16.msra.mxu0 %v1443_v49 }
 0x282   :  { %1034 = vmatpush2.bf16.msra.mxu1 %v1446_v50  ;;  %994 = vmatprep.subr.bf16.mxu0 %v1451_v51 }
 0x283   :  { %1035 = vmatprep.subr.bf16.mxu1 %v1454_v52 }
 0x285   :  { %995 = vmatpush2.bf16.msra.mxu0 %v1449_v53 }
 0x286   :  { %1036 = vmatpush2.bf16.msra.mxu1 %v1452_v54 }
 0x288   :  { %997 = vmatmul.mubr.bf16.vlgmr.msra.gmra.mxu0 %v98_v57 }
 0x289   :  { %1038 = vmatmul.mubr.bf16.vlgmr.msra.gmra.mxu1 %v100_v58 }
 0x308   :  { %v916_v59 = vpop.f32.mrf.mxu0 }
 0x309   :  { %v957_v60 = vpop.f32.mrf.mxu1  ;;  %v917_v10 = vadd.f32 %v916_v59, %v235_v8 }
 0x30a   :  { %v918_v61 = vpop.f32.mrf.mxu0 }
 0x30b   :  { %v959_v62 = vpop.f32.mrf.mxu1  ;;  %v919_v11 = vadd.f32 %v918_v61, %v239_v9  ;;  %v958_v12 = vadd.f32 %v957_v60, %v917_v10 }
 0x30c   :  { %v920_v63 = vpop.f32.mrf.mxu0 }
 0x30d   :  { %v961_v0 = vpop.f32.mrf.mxu1  ;;  %v960_v15 = vadd.f32 %v959_v62, %v919_v11 }
 0x30e   :  { %v921_v1 = vpop.f32.mrf.mxu0 }
 0x30f   :  { %v962_v2 = vpop.f32.mrf.mxu1 }
 0x348   :  { %v998_v13 = vpop.f32.mrf.mxu0 }
 0x349   :  { %v1039_v14 = vpop.f32.mrf.mxu1  ;;  %v999_v17 = vadd.f32 %v998_v13, %v958_v12 }
 0x34a   :  { %v1000_v18 = vpop.f32.mrf.mxu0 }
 0x34b   :  { %v1041_v19 = vpop.f32.mrf.mxu1  ;;  %v1040_v20 = vadd.f32 %v1039_v14, %v999_v17  ;;  %v1001_v21 = vadd.f32 %v1000_v18, %v960_v15 }
 0x34c   :  { %v1002_v6 = vpop.f32.mrf.mxu0 }
 0x34d   :  { %v1043_v22 = vpop.f32.mrf.mxu1  ;;  %v1059_v24 = vmul.f32 0.33333334, %v1040_v20  ;;  %v1042_v25 = vadd.f32 %v1041_v19, %v1001_v21 }
 0x34e   :  { %v1003_v26 = vpop.f32.mrf.mxu0 }
 0x34f   :  { %v1044_v27 = vpop.f32.mrf.mxu1  ;;  %1060 = vmax.xlane.f32.xlu0 %v1059_v24  ;;  %v1047_v28 = vsub.f32 %v1046_v23, %v1042_v25 }
 0x351   :  { %v1048_v29 = vmul.f32 %v1047_v28, %v1047_v28 }
 0x353   :  { %1049 = vadd.xlane.f32.xlu1 %v1048_v29 }
 0x3d8   :  { %v1061_v30 = vpop.xlane.xlu0 %1060 }
 0x3d9   :  { %v1062_v31 = vsub.f32 %v1059_v24, %v1061_v30 }
 0x3db   :  { %v1063_v32 = vmul.f32 1.442695, %v1062_v31 }
 0x3dc   :  { %v1050_v35 = vpop.xlane.xlu1 %1049 }
 0x3dd   :  { %1455 = vpow2.f32 %v1063_v32  ;;  %v1051_v36 = vrot.slane %v1050_v35, 4 }
 0x3df   :  { %v1052_v37 = vadd.f32 %v1051_v36, %v1050_v35 }
 0x3e1   :  { %v1053_v38 = vrot.slane %v1052_v37, 2 }
 0x3e3   :  { %v1054_v39 = vadd.f32 %v1053_v38, %v1052_v37 }
 0x3e5   :  { %v1055_v40 = vrot.slane %v1054_v39, 1 }
 0x3e7   :  { %v1056_v41 = vadd.f32 %v1055_v40, %v1054_v39 }
 0x3e9   :  { %1247 = vpush %v1056_v41 }
 0x3ea   :  { %v1456_v42 = vpop.eup %1455 }
 0x3eb   :  { %1065 = vadd.xlane.f32.xlu0 %v1456_v42 }
 0x41a   :  { %s1248_s5 = spop %1247 }
 0x41b   :  { %s1058_s6 = smul.f32 0.0009765625, %s1248_s5 }
 0x41d   :  { %1092 = sst [smem:[#allocation4 + $0x2]] %s1058_s6 }
 0x474   :  { %v1066_v43 = vpop.xlane.xlu0 %1065 }
 0x475   :  { %1457 = vlog2.f32 %v1066_v43 }
 0x476   :  { %1459 = vrcp.f32 %v1066_v43 }
 0x482   :  { %v1458_v44 = vpop.eup %1457 }
 0x483   :  { %v1068_v45 = vmul.f32 0.6931472, %v1458_v44  ;;  %v1460_v46 = vpop.eup %1459 }
 0x484   :  { %v1071_v48 = vmul.f32 %v1460_v46, %v1456_v42 }
 0x485   :  { %v1069_v47 = vsub.f32 %v1062_v31, %v1068_v45 }
 0x487   :  { %v1072_v49 = vsub.f32 %v1069_v47, %v81_v34 }
 0x489   :  { %v1073_v50 = vmul.f32 %v1072_v49, %v1071_v48 }
 0x48b   :  { %1074 = vadd.xlane.f32.xlu1 %v1073_v50 }
 0x514   :  { %v1075_v51 = vpop.xlane.xlu1 %1074 }
 0x515   :  { %v1076_v52 = vrot.slane %v1075_v51, 4 }
 0x517   :  { %v1077_v53 = vadd.f32 %v1076_v52, %v1075_v51 }
 0x519   :  { %v1078_v54 = vrot.slane %v1077_v53, 2 }
 0x51b   :  { %v1079_v55 = vadd.f32 %v1078_v54, %v1077_v53 }
 0x51d   :  { %v1080_v56 = vrot.slane %v1079_v55, 1 }
 0x51f   :  { %v1081_v57 = vadd.f32 %v1080_v56, %v1079_v55 }
 0x521   :  { %1249 = vpush %v1081_v57 }
 0x552   :  { %s1250_s28 = spop %1249 }
 0x553   :  { %s1083_s2 = smul.f32 0.0087890625, %s1250_s28 }
 0x555   :  { %s1085_s10 = smul.f32 0.5, %s1083_s2  ;;  %1090 = sst [smem:[#allocation4 + $0x1]] %s1083_s2 }
 0x557   :  { %s1086_s11 = sadd.f32 %s1085_s10, %s1084_s0 }
 0x559   :  { %1094 = sst [smem:[#allocation4 + $0x3]] %s1086_s11 }
 0x55a   :  { %1492 = shalt.err (!%p1489_p9)
}
 0x55b   :  { %s1499_s13 = smov [#allocation4]  }
 0x55c   :  { %1104 = dma.smem_to_vmem %s1499_s13, 16, %s1102_s8, [#allocation5]  }
 0x55d   :  { %1495 = dma.done.wait [#allocation5], 16  }
 0x55e   :  { %1496 = vsyncadd [#allocation5], 4294967280 }
 0x55f   :  { %1108 = sfence }
 0x560   :  { %1109 = vsyncpa [#allocation5], 1 }
 0x561   :  { %1110 = vsyncmov [#allocation3] }
 0x564   :  { %s1111_s7 = vpop.sfrf %1110 }
 0x565   :  { %p1244_p10 = scmp.ne.s32.totalorder %s1111_s7, 0 }
 0x567   :  { %1115 = shalt.err (%p1244_p10)  }

</bundles_post_ra>
